<compile_context>
chip_gen: v7x
topology: tpu7x:2x2x1
jax: 0.10.0
libtpu: 0.0.40
codegen_flags: <defaults>
</compile_context>

<pallas_src>
import functools

import jax
import jax.numpy as jnp
from jax.experimental import pallas as pl
from jax.experimental.pallas import tpu as pltpu

EPS = 1e-5  # InstanceNorm2d default eps


def conv_module_kernel(x_ref, coeff_ref, pw_ref, o_ref, *, H, W):
    """Processes NB images, each in (C, H*W) layout (channels on sublanes).

    x_ref:     (NB, Cin, HW)     input block
    coeff_ref: (2*9, Cout, HW)   per-tap depthwise coeffs (dw * edge mask), both layers
    pw_ref:    (Cout, 128)       packed [w1 | b1 | w2 | b2] (lane-padded to 128)
    o_ref:     (NB, Cout, HW)    output block
    """
    NB, Cin, HW = x_ref.shape
    Cout = o_ref.shape[1]
    inv_hw = 1.0 / float(HW)

    # One tiny load for all pointwise parameters (hoisted out of all loops).
    # Packed columns: [0,Cin)=w1 | Cin=b1 | [Cin+1,Cin+1+Cout)=w2 | Cin+1+Cout=b2
    pw = pw_ref[...]
    b1 = pw[:, Cin:Cin + 1]
    b2 = pw[:, Cin + 1 + Cout:Cin + 2 + Cout]

    # Static lane shifts for the 9 depthwise taps (dh, dw) in row-major order;
    # tap t multiplies x[h+dh, w+dw] which lives at flat index p + dh*W + dw.
    shifts = [(-(dh * W + dw)) % HW for dh in (-1, 0, 1) for dw in (-1, 0, 1)]

    def pointwise(x, col0, cin, bvec):
        # x: (cin, HW) -> (Cout, HW). VPU broadcast-FMA loop; at Cout=8 this beats
        # a tiny-K MXU matmul. For Cin/Cout >= ~64 switch to
        #   jnp.dot(wmat, x, preferred_element_type=jnp.float32) on the MXU.
        acc = jnp.zeros((Cout, HW), jnp.float32)
        for ci in range(cin):
            acc = acc + pw[:, col0 + ci:col0 + ci + 1] * x[ci:ci + 1, :]
        return acc + bvec

    def depthwise3x3(y, layer):
        # y: (Cout, HW). coeff[t] = dw[:, t] * edge_mask[t] precomputed in the
        # wrapper -> single multiply-add per tap. Depthwise bias is omitted on
        # purpose: it is exactly cancelled by the following InstanceNorm mean.
        acc = jnp.zeros((Cout, HW), jnp.float32)
        for t, s in enumerate(shifts):
            shifted = y if s == 0 else pltpu.roll(y, shift=s, axis=1)
            acc = acc + coeff_ref[layer * 9 + t] * shifted
        return acc

    def inst_norm_relu(z):
        # Single-pass statistics (sum, sum of squares) over the H*W lane axis.
        # (E[x^2]-E[x]^2 is fine at 2e-3 tolerance; switch to two-pass if tightened.)
        ssum = jnp.sum(z, axis=1, keepdims=True)
        ssq = jnp.sum(z * z, axis=1, keepdims=True)
        m = ssum * inv_hw
        v = ssq * inv_hw - m * m
        return jnp.maximum((z - m) * jax.lax.rsqrt(v + EPS), 0.0)

    # NB is capped (<=8) in the wrapper, so this bounded static unroll keeps
    # vreg pressure flat (equivalent to lax.fori_loop(..., unroll=True)).
    for b in range(NB):
        x = x_ref[b].astype(jnp.float32)                       # (Cin, HW)
        z = inst_norm_relu(depthwise3x3(pointwise(x, 0, Cin, b1), 0))
        z = inst_norm_relu(depthwise3x3(pointwise(z, Cin + 1, Cout, b2), 1))
        o_ref[b] = z.astype(o_ref.dtype)                       # unmasked lane-dense store


def _make_tap_masks(H, W):
    """(9, H*W) float 0/1 validity masks for the 3x3 taps (zero padding)."""
    HW = H * W
    p = jnp.arange(HW, dtype=jnp.int32)
    h = p // W
    w = p % W
    rows = []
    for dh in (-1, 0, 1):
        for dw in (-1, 0, 1):
            valid = ((h + dh >= 0) & (h + dh <= H - 1) &
                     (w + dw >= 0) & (w + dw <= W - 1))
            rows.append(valid.astype(jnp.float32))
    return jnp.stack(rows, axis=0)


def _tensorcores_per_chip():
    """Best-effort TC-per-chip count: 1 for v2/v3/v5e/v6e, 2 for megacore/v7x."""
    try:
        kind = jax.devices()[0].device_kind.lower()
    except Exception:
        return 2
    if ("lite" in kind or "v5e" in kind or "v6e" in kind
            or "v2" in kind or "v3" in kind):
        return 1
    return 2


def conv_module_forward(x_nchw, params, batch_block=None):
    """x_nchw: (N, Cin, H, W) float32 (PyTorch layout). Returns (N, Cout, H, W)."""
    N, Cin, H, W = x_nchw.shape
    Cout = params["w1"].shape[0]
    HW = H * W

    # Chip-aware grid sizing: single-TC chips get one grid step (per-step pipeline
    # overhead ~0.35us dominates this kernel); 2-TC chips keep >=2 "parallel" steps.
    if batch_block is None:
        if _tensorcores_per_chip() >= 2 and N >= 2:
            batch_block = max(1, N // 2)
        else:
            batch_block = N
    batch_block = max(1, min(batch_block, 8, N))   # bound the in-kernel batch unroll
    while N % batch_block:
        batch_block -= 1
    nb = batch_block

    x_flat = x_nchw.reshape(N, Cin, HW)            # free reshape, lane-dense last dim

    # Packed per-tap depthwise coefficient slab: coeff[layer*9+t, c, p] = dw[c,t]*mask[t,p].
    masks = _make_tap_masks(H, W)                                  # (9, HW)
    dw1 = params["dw1"].reshape(Cout, 9)
    dw2 = params["dw2"].reshape(Cout, 9)
    coeff = jnp.concatenate(
        [dw1.T[:, :, None] * masks[:, None, :],
         dw2.T[:, :, None] * masks[:, None, :]], axis=0)           # (18, Cout, HW)

    # Packed pointwise slab (lane-padded to 128 for clean, unmasked loads):
    # columns [0,Cin)=w1, Cin=b1, [Cin+1,Cin+1+Cout)=w2, Cin+1+Cout=b2.
    pw_cols = max(128, Cin + Cout + 2)
    pw = jnp.zeros((Cout, pw_cols), jnp.float32)
    pw = pw.at[:, 0:Cin].set(params["w1"])
    pw = pw.at[:, Cin].set(params["b1"])
    pw = pw.at[:, Cin + 1:Cin + 1 + Cout].set(params["w2"])
    pw = pw.at[:, Cin + 1 + Cout].set(params["b2"])
    # db1/db2 are intentionally NOT passed: they are algebraically cancelled by
    # the InstanceNorm mean subtraction that immediately follows the depthwise conv.

    out = pl.pallas_call(
        functools.partial(conv_module_kernel, H=H, W=W),
        out_shape=jax.ShapeDtypeStruct((N, Cout, HW), jnp.float32),
        grid=(N // nb,),
        in_specs=[
            pl.BlockSpec((nb, Cin, HW), lambda n: (n, 0, 0)),          # x
            pl.BlockSpec((18, Cout, HW), lambda n: (0, 0, 0)),         # depthwise coeffs
            pl.BlockSpec((Cout, pw_cols), lambda n: (0, 0)),           # packed pointwise params
        ],
        out_specs=pl.BlockSpec((nb, Cout, HW), lambda n: (n, 0, 0)),
        compiler_params=pltpu.CompilerParams(dimension_semantics=("parallel",)),
    )(x_flat, coeff, pw)

    return out.reshape(N, Cout, H, W)


def ref_forward(x_nchw, params):
    """Pure-JAX/XLA reference (NCHW) for correctness checking (uses db1/db2)."""
    def pconv(x, w, b):
        return jnp.einsum("nchw,oc->nohw", x, w) + b.reshape(1, -1, 1, 1)

    def dconv(x, k, b):
        c = x.shape[1]
        w = k[:, None, :, :]  # (C, 1, 3, 3) OIHW with I=1, groups=C
        y = jax.lax.conv_general_dilated(
            x, w, window_strides=(1, 1), padding=((1, 1), (1, 1)),
            dimension_numbers=("NCHW", "OIHW", "NCHW"),
            feature_group_count=c)
        return y + b.reshape(1, -1, 1, 1)

    def inorm_relu(x):
        m = jnp.mean(x, axis=(2, 3), keepdims=True)
        v = jnp.mean((x - m) ** 2, axis=(2, 3), keepdims=True)
        return jnp.maximum((x - m) * jax.lax.rsqrt(v + EPS), 0.0)

    z = inorm_relu(dconv(pconv(x_nchw, params["w1"], params["b1"]),
                         params["dw1"], params["db1"]))
    z = inorm_relu(dconv(pconv(z, params["w2"], params["b2"]),
                         params["dw2"], params["db2"]))
    return z


def init_params(key, in_dim, out_dim):
    ks = jax.random.split(key, 8)
    f32 = jnp.float32
    return {
        "w1": jax.random.normal(ks[0], (out_dim, in_dim), f32) * 0.3,
        "b1": jax.random.normal(ks[1], (out_dim,), f32) * 0.1,
        "dw1": jax.random.normal(ks[2], (out_dim, 3, 3), f32) * 0.3,
        "db1": jax.random.normal(ks[3], (out_dim,), f32) * 0.1,
        "w2": jax.random.normal(ks[4], (out_dim, out_dim), f32) * 0.3,
        "b2": jax.random.normal(ks[5], (out_dim,), f32) * 0.1,
        "dw2": jax.random.normal(ks[6], (out_dim, 3, 3), f32) * 0.3,
        "db2": jax.random.normal(ks[7], (out_dim,), f32) * 0.1,
    }


if __name__ == "__main__":
    # Small shapes consistent with the module: batch=2, in_dim=4, out_dim=8, 16x16 spatial.
    N, C_IN, C_OUT, H, W = 2, 4, 8, 16, 16

    key = jax.random.PRNGKey(0)
    k_params, k_x = jax.random.split(key)
    params = init_params(k_params, C_IN, C_OUT)

    x_nchw = jax.random.normal(k_x, (N, C_IN, H, W), jnp.float32)  # PyTorch-style input

    out = jax.block_until_ready(conv_module_forward(x_nchw, params))
    ref = jax.block_until_ready(ref_forward(x_nchw, params))

    assert out.shape == (N, C_OUT, H, W), out.shape
    max_err = float(jnp.max(jnp.abs(out - ref)))
    assert jnp.allclose(out, ref, rtol=2e-3, atol=2e-3), max_err

    print("KERNEL_OK")
</pallas_src>

<mosaic_0001>
module attributes {stable_mosaic.version = 11 : i64} {
  func.func @conv_module_kernel(%arg0: i32, %arg1: memref<1x4x256xf32, #tpu.memory_space<vmem>>, %arg2: memref<18x8x256xf32, #tpu.memory_space<vmem>>, %arg3: memref<8x128xf32, #tpu.memory_space<vmem>>, %arg4: memref<1x8x256xf32, #tpu.memory_space<vmem>>) attributes {dimension_semantics = [#tpu.dimension_semantics<parallel>], iteration_bounds = array<i64: 2>, scalar_prefetch = 0 : i64, scratch_operands = 0 : i64, tpu.core_type = #tpu.core_type<tc>, window_params = [{transform_indices = @transform_0, window_bounds = array<i64: 1, 4, 256>}, {pipeline_mode = #tpu.pipeline_mode<synchronous>, transform_indices = @transform_1, window_bounds = array<i64: 18, 8, 256>}, {pipeline_mode = #tpu.pipeline_mode<synchronous>, transform_indices = @transform_2, window_bounds = array<i64: 8, 128>}, {transform_indices = @transform_3, window_bounds = array<i64: 1, 8, 256>}]} {
    %c0 = arith.constant 0 : index
    %c0_0 = arith.constant 0 : index
    %0 = vector.load %arg3[%c0, %c0_0] : memref<8x128xf32, #tpu.memory_space<vmem>>, vector<8x128xf32>
    %1 = vector.extract_strided_slice %0 {offsets = [0, 4], sizes = [8, 1], strides = [1, 1]} : vector<8x128xf32> to vector<8x1xf32>
    %2 = vector.extract_strided_slice %0 {offsets = [0, 13], sizes = [8, 1], strides = [1, 1]} : vector<8x128xf32> to vector<8x1xf32>
    %c0_1 = arith.constant 0 : index
    %c0_2 = arith.constant 0 : index
    %c0_3 = arith.constant 0 : index
    %3 = vector.load %arg1[%c0_1, %c0_2, %c0_3] : memref<1x4x256xf32, #tpu.memory_space<vmem>>, vector<1x4x256xf32>
    %4 = vector.shape_cast %3 : vector<1x4x256xf32> to vector<4x256xf32>
    %cst = arith.constant 0.000000e+00 : f32
    %5 = vector.broadcast %cst : f32 to vector<8x256xf32>
    %6 = vector.extract_strided_slice %0 {offsets = [0, 0], sizes = [8, 1], strides = [1, 1]} : vector<8x128xf32> to vector<8x1xf32>
    %7 = vector.extract_strided_slice %4 {offsets = [0, 0], sizes = [1, 256], strides = [1, 1]} : vector<4x256xf32> to vector<1x256xf32>
    %8 = vector.broadcast %6 : vector<8x1xf32> to vector<8x256xf32>
    %9 = vector.broadcast %7 : vector<1x256xf32> to vector<8x256xf32>
    %10 = arith.mulf %8, %9 : vector<8x256xf32>
    %11 = arith.addf %5, %10 : vector<8x256xf32>
    %12 = vector.extract_strided_slice %0 {offsets = [0, 1], sizes = [8, 1], strides = [1, 1]} : vector<8x128xf32> to vector<8x1xf32>
    %13 = vector.extract_strided_slice %4 {offsets = [1, 0], sizes = [1, 256], strides = [1, 1]} : vector<4x256xf32> to vector<1x256xf32>
    %14 = vector.broadcast %12 : vector<8x1xf32> to vector<8x256xf32>
    %15 = vector.broadcast %13 : vector<1x256xf32> to vector<8x256xf32>
    %16 = arith.mulf %14, %15 : vector<8x256xf32>
    %17 = arith.addf %11, %16 : vector<8x256xf32>
    %18 = vector.extract_strided_slice %0 {offsets = [0, 2], sizes = [8, 1], strides = [1, 1]} : vector<8x128xf32> to vector<8x1xf32>
    %19 = vector.extract_strided_slice %4 {offsets = [2, 0], sizes = [1, 256], strides = [1, 1]} : vector<4x256xf32> to vector<1x256xf32>
    %20 = vector.broadcast %18 : vector<8x1xf32> to vector<8x256xf32>
    %21 = vector.broadcast %19 : vector<1x256xf32> to vector<8x256xf32>
    %22 = arith.mulf %20, %21 : vector<8x256xf32>
    %23 = arith.addf %17, %22 : vector<8x256xf32>
    %24 = vector.extract_strided_slice %0 {offsets = [0, 3], sizes = [8, 1], strides = [1, 1]} : vector<8x128xf32> to vector<8x1xf32>
    %25 = vector.extract_strided_slice %4 {offsets = [3, 0], sizes = [1, 256], strides = [1, 1]} : vector<4x256xf32> to vector<1x256xf32>
    %26 = vector.broadcast %24 : vector<8x1xf32> to vector<8x256xf32>
    %27 = vector.broadcast %25 : vector<1x256xf32> to vector<8x256xf32>
    %28 = arith.mulf %26, %27 : vector<8x256xf32>
    %29 = arith.addf %23, %28 : vector<8x256xf32>
    %30 = vector.broadcast %1 : vector<8x1xf32> to vector<8x256xf32>
    %31 = arith.addf %29, %30 : vector<8x256xf32>
    %cst_4 = arith.constant 0.000000e+00 : f32
    %32 = vector.broadcast %cst_4 : f32 to vector<8x256xf32>
    %c17_i32 = arith.constant 17 : i32
    %33 = tpu.dynamic_rotate %31 by %c17_i32 dim 1 : vector<8x256xf32>, i32 -> vector<8x256xf32>
    %c0_5 = arith.constant 0 : index
    %c0_6 = arith.constant 0 : index
    %c0_7 = arith.constant 0 : index
    %34 = vector.load %arg2[%c0_5, %c0_6, %c0_7] : memref<18x8x256xf32, #tpu.memory_space<vmem>>, vector<1x8x256xf32>
    %35 = vector.shape_cast %34 : vector<1x8x256xf32> to vector<8x256xf32>
    %36 = arith.mulf %35, %33 : vector<8x256xf32>
    %37 = arith.addf %32, %36 : vector<8x256xf32>
    %c16_i32 = arith.constant 16 : i32
    %38 = tpu.dynamic_rotate %31 by %c16_i32 dim 1 : vector<8x256xf32>, i32 -> vector<8x256xf32>
    %c1 = arith.constant 1 : index
    %c0_8 = arith.constant 0 : index
    %c0_9 = arith.constant 0 : index
    %39 = vector.load %arg2[%c1, %c0_8, %c0_9] : memref<18x8x256xf32, #tpu.memory_space<vmem>>, vector<1x8x256xf32>
    %40 = vector.shape_cast %39 : vector<1x8x256xf32> to vector<8x256xf32>
    %41 = arith.mulf %40, %38 : vector<8x256xf32>
    %42 = arith.addf %37, %41 : vector<8x256xf32>
    %c15_i32 = arith.constant 15 : i32
    %43 = tpu.dynamic_rotate %31 by %c15_i32 dim 1 : vector<8x256xf32>, i32 -> vector<8x256xf32>
    %c2 = arith.constant 2 : index
    %c0_10 = arith.constant 0 : index
    %c0_11 = arith.constant 0 : index
    %44 = vector.load %arg2[%c2, %c0_10, %c0_11] : memref<18x8x256xf32, #tpu.memory_space<vmem>>, vector<1x8x256xf32>
    %45 = vector.shape_cast %44 : vector<1x8x256xf32> to vector<8x256xf32>
    %46 = arith.mulf %45, %43 : vector<8x256xf32>
    %47 = arith.addf %42, %46 : vector<8x256xf32>
    %c1_i32 = arith.constant 1 : i32
    %48 = tpu.dynamic_rotate %31 by %c1_i32 dim 1 : vector<8x256xf32>, i32 -> vector<8x256xf32>
    %c3 = arith.constant 3 : index
    %c0_12 = arith.constant 0 : index
    %c0_13 = arith.constant 0 : index
    %49 = vector.load %arg2[%c3, %c0_12, %c0_13] : memref<18x8x256xf32, #tpu.memory_space<vmem>>, vector<1x8x256xf32>
    %50 = vector.shape_cast %49 : vector<1x8x256xf32> to vector<8x256xf32>
    %51 = arith.mulf %50, %48 : vector<8x256xf32>
    %52 = arith.addf %47, %51 : vector<8x256xf32>
    %c4 = arith.constant 4 : index
    %c0_14 = arith.constant 0 : index
    %c0_15 = arith.constant 0 : index
    %53 = vector.load %arg2[%c4, %c0_14, %c0_15] : memref<18x8x256xf32, #tpu.memory_space<vmem>>, vector<1x8x256xf32>
    %54 = vector.shape_cast %53 : vector<1x8x256xf32> to vector<8x256xf32>
    %55 = arith.mulf %54, %31 : vector<8x256xf32>
    %56 = arith.addf %52, %55 : vector<8x256xf32>
    %c255_i32 = arith.constant 255 : i32
    %57 = tpu.dynamic_rotate %31 by %c255_i32 dim 1 : vector<8x256xf32>, i32 -> vector<8x256xf32>
    %c5 = arith.constant 5 : index
    %c0_16 = arith.constant 0 : index
    %c0_17 = arith.constant 0 : index
    %58 = vector.load %arg2[%c5, %c0_16, %c0_17] : memref<18x8x256xf32, #tpu.memory_space<vmem>>, vector<1x8x256xf32>
    %59 = vector.shape_cast %58 : vector<1x8x256xf32> to vector<8x256xf32>
    %60 = arith.mulf %59, %57 : vector<8x256xf32>
    %61 = arith.addf %56, %60 : vector<8x256xf32>
    %c241_i32 = arith.constant 241 : i32
    %62 = tpu.dynamic_rotate %31 by %c241_i32 dim 1 : vector<8x256xf32>, i32 -> vector<8x256xf32>
    %c6 = arith.constant 6 : index
    %c0_18 = arith.constant 0 : index
    %c0_19 = arith.constant 0 : index
    %63 = vector.load %arg2[%c6, %c0_18, %c0_19] : memref<18x8x256xf32, #tpu.memory_space<vmem>>, vector<1x8x256xf32>
    %64 = vector.shape_cast %63 : vector<1x8x256xf32> to vector<8x256xf32>
    %65 = arith.mulf %64, %62 : vector<8x256xf32>
    %66 = arith.addf %61, %65 : vector<8x256xf32>
    %c240_i32 = arith.constant 240 : i32
    %67 = tpu.dynamic_rotate %31 by %c240_i32 dim 1 : vector<8x256xf32>, i32 -> vector<8x256xf32>
    %c7 = arith.constant 7 : index
    %c0_20 = arith.constant 0 : index
    %c0_21 = arith.constant 0 : index
    %68 = vector.load %arg2[%c7, %c0_20, %c0_21] : memref<18x8x256xf32, #tpu.memory_space<vmem>>, vector<1x8x256xf32>
    %69 = vector.shape_cast %68 : vector<1x8x256xf32> to vector<8x256xf32>
    %70 = arith.mulf %69, %67 : vector<8x256xf32>
    %71 = arith.addf %66, %70 : vector<8x256xf32>
    %c239_i32 = arith.constant 239 : i32
    %72 = tpu.dynamic_rotate %31 by %c239_i32 dim 1 : vector<8x256xf32>, i32 -> vector<8x256xf32>
    %c8 = arith.constant 8 : index
    %c0_22 = arith.constant 0 : index
    %c0_23 = arith.constant 0 : index
    %73 = vector.load %arg2[%c8, %c0_22, %c0_23] : memref<18x8x256xf32, #tpu.memory_space<vmem>>, vector<1x8x256xf32>
    %74 = vector.shape_cast %73 : vector<1x8x256xf32> to vector<8x256xf32>
    %75 = arith.mulf %74, %72 : vector<8x256xf32>
    %76 = arith.addf %71, %75 : vector<8x256xf32>
    %cst_24 = arith.constant dense<0.000000e+00> : vector<8xf32>
    %77 = vector.multi_reduction <add>, %76, %cst_24 [1] : vector<8x256xf32> to vector<8xf32>
    %78 = vector.shape_cast %77 : vector<8xf32> to vector<8x1xf32>
    %79 = arith.mulf %76, %76 : vector<8x256xf32>
    %cst_25 = arith.constant dense<0.000000e+00> : vector<8xf32>
    %80 = vector.multi_reduction <add>, %79, %cst_25 [1] : vector<8x256xf32> to vector<8xf32>
    %81 = vector.shape_cast %80 : vector<8xf32> to vector<8x1xf32>
    %cst_26 = arith.constant 3.906250e-03 : f32
    %82 = vector.broadcast %cst_26 : f32 to vector<8x1xf32>
    %83 = arith.mulf %78, %82 : vector<8x1xf32>
    %cst_27 = arith.constant 3.906250e-03 : f32
    %84 = vector.broadcast %cst_27 : f32 to vector<8x1xf32>
    %85 = arith.mulf %81, %84 : vector<8x1xf32>
    %86 = arith.mulf %83, %83 : vector<8x1xf32>
    %87 = arith.subf %85, %86 : vector<8x1xf32>
    %88 = vector.broadcast %83 : vector<8x1xf32> to vector<8x256xf32>
    %89 = arith.subf %76, %88 : vector<8x256xf32>
    %cst_28 = arith.constant 9.99999974E-6 : f32
    %90 = vector.broadcast %cst_28 : f32 to vector<8x1xf32>
    %91 = arith.addf %87, %90 : vector<8x1xf32>
    %92 = math.rsqrt %91 : vector<8x1xf32>
    %93 = vector.broadcast %92 : vector<8x1xf32> to vector<8x256xf32>
    %94 = arith.mulf %89, %93 : vector<8x256xf32>
    %cst_29 = arith.constant 0.000000e+00 : f32
    %95 = vector.broadcast %cst_29 : f32 to vector<8x256xf32>
    %96 = arith.maximumf %94, %95 : vector<8x256xf32>
    %cst_30 = arith.constant 0.000000e+00 : f32
    %97 = vector.broadcast %cst_30 : f32 to vector<8x256xf32>
    %98 = vector.extract_strided_slice %0 {offsets = [0, 5], sizes = [8, 1], strides = [1, 1]} : vector<8x128xf32> to vector<8x1xf32>
    %99 = vector.extract_strided_slice %96 {offsets = [0, 0], sizes = [1, 256], strides = [1, 1]} : vector<8x256xf32> to vector<1x256xf32>
    %100 = vector.broadcast %98 : vector<8x1xf32> to vector<8x256xf32>
    %101 = vector.broadcast %99 : vector<1x256xf32> to vector<8x256xf32>
    %102 = arith.mulf %100, %101 : vector<8x256xf32>
    %103 = arith.addf %97, %102 : vector<8x256xf32>
    %104 = vector.extract_strided_slice %0 {offsets = [0, 6], sizes = [8, 1], strides = [1, 1]} : vector<8x128xf32> to vector<8x1xf32>
    %105 = vector.extract_strided_slice %96 {offsets = [1, 0], sizes = [1, 256], strides = [1, 1]} : vector<8x256xf32> to vector<1x256xf32>
    %106 = vector.broadcast %104 : vector<8x1xf32> to vector<8x256xf32>
    %107 = vector.broadcast %105 : vector<1x256xf32> to vector<8x256xf32>
    %108 = arith.mulf %106, %107 : vector<8x256xf32>
    %109 = arith.addf %103, %108 : vector<8x256xf32>
    %110 = vector.extract_strided_slice %0 {offsets = [0, 7], sizes = [8, 1], strides = [1, 1]} : vector<8x128xf32> to vector<8x1xf32>
    %111 = vector.extract_strided_slice %96 {offsets = [2, 0], sizes = [1, 256], strides = [1, 1]} : vector<8x256xf32> to vector<1x256xf32>
    %112 = vector.broadcast %110 : vector<8x1xf32> to vector<8x256xf32>
    %113 = vector.broadcast %111 : vector<1x256xf32> to vector<8x256xf32>
    %114 = arith.mulf %112, %113 : vector<8x256xf32>
    %115 = arith.addf %109, %114 : vector<8x256xf32>
    %116 = vector.extract_strided_slice %0 {offsets = [0, 8], sizes = [8, 1], strides = [1, 1]} : vector<8x128xf32> to vector<8x1xf32>
    %117 = vector.extract_strided_slice %96 {offsets = [3, 0], sizes = [1, 256], strides = [1, 1]} : vector<8x256xf32> to vector<1x256xf32>
    %118 = vector.broadcast %116 : vector<8x1xf32> to vector<8x256xf32>
    %119 = vector.broadcast %117 : vector<1x256xf32> to vector<8x256xf32>
    %120 = arith.mulf %118, %119 : vector<8x256xf32>
    %121 = arith.addf %115, %120 : vector<8x256xf32>
    %122 = vector.extract_strided_slice %0 {offsets = [0, 9], sizes = [8, 1], strides = [1, 1]} : vector<8x128xf32> to vector<8x1xf32>
    %123 = vector.extract_strided_slice %96 {offsets = [4, 0], sizes = [1, 256], strides = [1, 1]} : vector<8x256xf32> to vector<1x256xf32>
    %124 = vector.broadcast %122 : vector<8x1xf32> to vector<8x256xf32>
    %125 = vector.broadcast %123 : vector<1x256xf32> to vector<8x256xf32>
    %126 = arith.mulf %124, %125 : vector<8x256xf32>
    %127 = arith.addf %121, %126 : vector<8x256xf32>
    %128 = vector.extract_strided_slice %0 {offsets = [0, 10], sizes = [8, 1], strides = [1, 1]} : vector<8x128xf32> to vector<8x1xf32>
    %129 = vector.extract_strided_slice %96 {offsets = [5, 0], sizes = [1, 256], strides = [1, 1]} : vector<8x256xf32> to vector<1x256xf32>
    %130 = vector.broadcast %128 : vector<8x1xf32> to vector<8x256xf32>
    %131 = vector.broadcast %129 : vector<1x256xf32> to vector<8x256xf32>
    %132 = arith.mulf %130, %131 : vector<8x256xf32>
    %133 = arith.addf %127, %132 : vector<8x256xf32>
    %134 = vector.extract_strided_slice %0 {offsets = [0, 11], sizes = [8, 1], strides = [1, 1]} : vector<8x128xf32> to vector<8x1xf32>
    %135 = vector.extract_strided_slice %96 {offsets = [6, 0], sizes = [1, 256], strides = [1, 1]} : vector<8x256xf32> to vector<1x256xf32>
    %136 = vector.broadcast %134 : vector<8x1xf32> to vector<8x256xf32>
    %137 = vector.broadcast %135 : vector<1x256xf32> to vector<8x256xf32>
    %138 = arith.mulf %136, %137 : vector<8x256xf32>
    %139 = arith.addf %133, %138 : vector<8x256xf32>
    %140 = vector.extract_strided_slice %0 {offsets = [0, 12], sizes = [8, 1], strides = [1, 1]} : vector<8x128xf32> to vector<8x1xf32>
    %141 = vector.extract_strided_slice %96 {offsets = [7, 0], sizes = [1, 256], strides = [1, 1]} : vector<8x256xf32> to vector<1x256xf32>
    %142 = vector.broadcast %140 : vector<8x1xf32> to vector<8x256xf32>
    %143 = vector.broadcast %141 : vector<1x256xf32> to vector<8x256xf32>
    %144 = arith.mulf %142, %143 : vector<8x256xf32>
    %145 = arith.addf %139, %144 : vector<8x256xf32>
    %146 = vector.broadcast %2 : vector<8x1xf32> to vector<8x256xf32>
    %147 = arith.addf %145, %146 : vector<8x256xf32>
    %cst_31 = arith.constant 0.000000e+00 : f32
    %148 = vector.broadcast %cst_31 : f32 to vector<8x256xf32>
    %c17_i32_32 = arith.constant 17 : i32
    %149 = tpu.dynamic_rotate %147 by %c17_i32_32 dim 1 : vector<8x256xf32>, i32 -> vector<8x256xf32>
    %c9 = arith.constant 9 : index
    %c0_33 = arith.constant 0 : index
    %c0_34 = arith.constant 0 : index
    %150 = vector.load %arg2[%c9, %c0_33, %c0_34] : memref<18x8x256xf32, #tpu.memory_space<vmem>>, vector<1x8x256xf32>
    %151 = vector.shape_cast %150 : vector<1x8x256xf32> to vector<8x256xf32>
    %152 = arith.mulf %151, %149 : vector<8x256xf32>
    %153 = arith.addf %148, %152 : vector<8x256xf32>
    %c16_i32_35 = arith.constant 16 : i32
    %154 = tpu.dynamic_rotate %147 by %c16_i32_35 dim 1 : vector<8x256xf32>, i32 -> vector<8x256xf32>
    %c10 = arith.constant 10 : index
    %c0_36 = arith.constant 0 : index
    %c0_37 = arith.constant 0 : index
    %155 = vector.load %arg2[%c10, %c0_36, %c0_37] : memref<18x8x256xf32, #tpu.memory_space<vmem>>, vector<1x8x256xf32>
    %156 = vector.shape_cast %155 : vector<1x8x256xf32> to vector<8x256xf32>
    %157 = arith.mulf %156, %154 : vector<8x256xf32>
    %158 = arith.addf %153, %157 : vector<8x256xf32>
    %c15_i32_38 = arith.constant 15 : i32
    %159 = tpu.dynamic_rotate %147 by %c15_i32_38 dim 1 : vector<8x256xf32>, i32 -> vector<8x256xf32>
    %c11 = arith.constant 11 : index
    %c0_39 = arith.constant 0 : index
    %c0_40 = arith.constant 0 : index
    %160 = vector.load %arg2[%c11, %c0_39, %c0_40] : memref<18x8x256xf32, #tpu.memory_space<vmem>>, vector<1x8x256xf32>
    %161 = vector.shape_cast %160 : vector<1x8x256xf32> to vector<8x256xf32>
    %162 = arith.mulf %161, %159 : vector<8x256xf32>
    %163 = arith.addf %158, %162 : vector<8x256xf32>
    %c1_i32_41 = arith.constant 1 : i32
    %164 = tpu.dynamic_rotate %147 by %c1_i32_41 dim 1 : vector<8x256xf32>, i32 -> vector<8x256xf32>
    %c12 = arith.constant 12 : index
    %c0_42 = arith.constant 0 : index
    %c0_43 = arith.constant 0 : index
    %165 = vector.load %arg2[%c12, %c0_42, %c0_43] : memref<18x8x256xf32, #tpu.memory_space<vmem>>, vector<1x8x256xf32>
    %166 = vector.shape_cast %165 : vector<1x8x256xf32> to vector<8x256xf32>
    %167 = arith.mulf %166, %164 : vector<8x256xf32>
    %168 = arith.addf %163, %167 : vector<8x256xf32>
    %c13 = arith.constant 13 : index
    %c0_44 = arith.constant 0 : index
    %c0_45 = arith.constant 0 : index
    %169 = vector.load %arg2[%c13, %c0_44, %c0_45] : memref<18x8x256xf32, #tpu.memory_space<vmem>>, vector<1x8x256xf32>
    %170 = vector.shape_cast %169 : vector<1x8x256xf32> to vector<8x256xf32>
    %171 = arith.mulf %170, %147 : vector<8x256xf32>
    %172 = arith.addf %168, %171 : vector<8x256xf32>
    %c255_i32_46 = arith.constant 255 : i32
    %173 = tpu.dynamic_rotate %147 by %c255_i32_46 dim 1 : vector<8x256xf32>, i32 -> vector<8x256xf32>
    %c14 = arith.constant 14 : index
    %c0_47 = arith.constant 0 : index
    %c0_48 = arith.constant 0 : index
    %174 = vector.load %arg2[%c14, %c0_47, %c0_48] : memref<18x8x256xf32, #tpu.memory_space<vmem>>, vector<1x8x256xf32>
    %175 = vector.shape_cast %174 : vector<1x8x256xf32> to vector<8x256xf32>
    %176 = arith.mulf %175, %173 : vector<8x256xf32>
    %177 = arith.addf %172, %176 : vector<8x256xf32>
    %c241_i32_49 = arith.constant 241 : i32
    %178 = tpu.dynamic_rotate %147 by %c241_i32_49 dim 1 : vector<8x256xf32>, i32 -> vector<8x256xf32>
    %c15 = arith.constant 15 : index
    %c0_50 = arith.constant 0 : index
    %c0_51 = arith.constant 0 : index
    %179 = vector.load %arg2[%c15, %c0_50, %c0_51] : memref<18x8x256xf32, #tpu.memory_space<vmem>>, vector<1x8x256xf32>
    %180 = vector.shape_cast %179 : vector<1x8x256xf32> to vector<8x256xf32>
    %181 = arith.mulf %180, %178 : vector<8x256xf32>
    %182 = arith.addf %177, %181 : vector<8x256xf32>
    %c240_i32_52 = arith.constant 240 : i32
    %183 = tpu.dynamic_rotate %147 by %c240_i32_52 dim 1 : vector<8x256xf32>, i32 -> vector<8x256xf32>
    %c16 = arith.constant 16 : index
    %c0_53 = arith.constant 0 : index
    %c0_54 = arith.constant 0 : index
    %184 = vector.load %arg2[%c16, %c0_53, %c0_54] : memref<18x8x256xf32, #tpu.memory_space<vmem>>, vector<1x8x256xf32>
    %185 = vector.shape_cast %184 : vector<1x8x256xf32> to vector<8x256xf32>
    %186 = arith.mulf %185, %183 : vector<8x256xf32>
    %187 = arith.addf %182, %186 : vector<8x256xf32>
    %c239_i32_55 = arith.constant 239 : i32
    %188 = tpu.dynamic_rotate %147 by %c239_i32_55 dim 1 : vector<8x256xf32>, i32 -> vector<8x256xf32>
    %c17 = arith.constant 17 : index
    %c0_56 = arith.constant 0 : index
    %c0_57 = arith.constant 0 : index
    %189 = vector.load %arg2[%c17, %c0_56, %c0_57] : memref<18x8x256xf32, #tpu.memory_space<vmem>>, vector<1x8x256xf32>
    %190 = vector.shape_cast %189 : vector<1x8x256xf32> to vector<8x256xf32>
    %191 = arith.mulf %190, %188 : vector<8x256xf32>
    %192 = arith.addf %187, %191 : vector<8x256xf32>
    %cst_58 = arith.constant dense<0.000000e+00> : vector<8xf32>
    %193 = vector.multi_reduction <add>, %192, %cst_58 [1] : vector<8x256xf32> to vector<8xf32>
    %194 = vector.shape_cast %193 : vector<8xf32> to vector<8x1xf32>
    %195 = arith.mulf %192, %192 : vector<8x256xf32>
    %cst_59 = arith.constant dense<0.000000e+00> : vector<8xf32>
    %196 = vector.multi_reduction <add>, %195, %cst_59 [1] : vector<8x256xf32> to vector<8xf32>
    %197 = vector.shape_cast %196 : vector<8xf32> to vector<8x1xf32>
    %cst_60 = arith.constant 3.906250e-03 : f32
    %198 = vector.broadcast %cst_60 : f32 to vector<8x1xf32>
    %199 = arith.mulf %194, %198 : vector<8x1xf32>
    %cst_61 = arith.constant 3.906250e-03 : f32
    %200 = vector.broadcast %cst_61 : f32 to vector<8x1xf32>
    %201 = arith.mulf %197, %200 : vector<8x1xf32>
    %202 = arith.mulf %199, %199 : vector<8x1xf32>
    %203 = arith.subf %201, %202 : vector<8x1xf32>
    %204 = vector.broadcast %199 : vector<8x1xf32> to vector<8x256xf32>
    %205 = arith.subf %192, %204 : vector<8x256xf32>
    %cst_62 = arith.constant 9.99999974E-6 : f32
    %206 = vector.broadcast %cst_62 : f32 to vector<8x1xf32>
    %207 = arith.addf %203, %206 : vector<8x1xf32>
    %208 = math.rsqrt %207 : vector<8x1xf32>
    %209 = vector.broadcast %208 : vector<8x1xf32> to vector<8x256xf32>
    %210 = arith.mulf %205, %209 : vector<8x256xf32>
    %cst_63 = arith.constant 0.000000e+00 : f32
    %211 = vector.broadcast %cst_63 : f32 to vector<8x256xf32>
    %212 = arith.maximumf %210, %211 : vector<8x256xf32>
    %c0_64 = arith.constant 0 : index
    %c0_65 = arith.constant 0 : index
    %c0_66 = arith.constant 0 : index
    %213 = vector.load %arg4[%c0_64, %c0_65, %c0_66] : memref<1x8x256xf32, #tpu.memory_space<vmem>>, vector<1x8x256xf32>
    %214 = vector.shape_cast %213 : vector<1x8x256xf32> to vector<8x256xf32>
    %215 = vector.shape_cast %212 : vector<8x256xf32> to vector<1x8x256xf32>
    tpu.vector_store %arg4[%c0_64, %c0_65, %c0_66], %215 {strides = array<i32>} : memref<1x8x256xf32, #tpu.memory_space<vmem>>, vector<1x8x256xf32>,
    return
  }
  func.func @transform_0(%arg0: i32) -> (i32, i32, i32) {
    %c0_i32 = arith.constant 0 : i32
    %c0_i32_0 = arith.constant 0 : i32
    %c0_i32_1 = arith.constant 0 : i32
    return %arg0, %c0_i32, %c0_i32_0 : i32, i32, i32
  }
  func.func @transform_1(%arg0: i32) -> (i32, i32, i32) {
    %c0_i32 = arith.constant 0 : i32
    %c0_i32_0 = arith.constant 0 : i32
    %c0_i32_1 = arith.constant 0 : i32
    %c0_i32_2 = arith.constant 0 : i32
    return %c0_i32, %c0_i32_0, %c0_i32_1 : i32, i32, i32
  }
  func.func @transform_2(%arg0: i32) -> (i32, i32) {
    %c0_i32 = arith.constant 0 : i32
    %c0_i32_0 = arith.constant 0 : i32
    %c0_i32_1 = arith.constant 0 : i32
    return %c0_i32, %c0_i32_0 : i32, i32
  }
  func.func @transform_3(%arg0: i32) -> (i32, i32, i32) {
    %c0_i32 = arith.constant 0 : i32
    %c0_i32_0 = arith.constant 0 : i32
    %c0_i32_1 = arith.constant 0 : i32
    return %arg0, %c0_i32, %c0_i32_0 : i32, i32, i32
  }
}

</mosaic_0001>

<bundles_post_ra>
// kernel: tpu_custom_call.1
= control target key start
LH: loop header
LB: loop body
LE: loop exit
PB: predicated region body
PF: predicated region fallthrough
CT: control target
= control target key end

     0   :  { %8 = vsyncpa [#allocation3], 0  ;;  %s1620_s0 = inlined_call_operand.hbm [shape: f32[2,4,256], index: 0, kind: input, shape index: {}]   ;;  %s1621_s1 = inlined_call_operand.hbm [shape: f32[18,8,256], index: 1, kind: input, shape index: {}]   ;;  %s1622_s2 = inlined_call_operand.hbm [shape: f32[8,128], index: 2, kind: input, shape index: {}]   ;;  %s1623_s3 = inlined_call_operand.hbm [shape: f32[2,8,256], index: 3, kind: output, shape index: {}]  }
   0x1   :  { %10 = vsyncpa [#allocation3 + $0x1], 0 }
   0x2   :  { %11 = vsyncpa [#allocation6], 0 }
   0x3   :  { %12 = vsyncpa [#allocation4], 0 }
   0x4   :  { %14 = vsyncpa [#allocation4 + $0x1], 0  ;;  %s1174_s12 = smov 0   ;;  %s1176_s13 = smov 0  }
   0x5   :  { %s1178_s14 = smov 0   ;;  %s1180_s15 = smov 0  }
   0x6 LB: > { %s1195_s16 = sadd.s32 4294967295, %s1124_s15   ;;  %s839_s17 = sadd.s32 4294967294, %s1124_s15   ;;  %s1124_s15 = sphi %s1180_s15, %s1643_s15   ;;  %s1120_s14 = sphi %s1178_s14, %s1642_s14   ;;  %s1116_s13 = sphi %s1176_s13, %s1641_s13   ;;  %s1112_s12 = sphi %s1174_s12, %s1640_s12  }
   0x7   : > { %p40_p0 = scmp.ne.s32.totalorder %s1116_s13, %s1112_s12  ;;  %p1624_p1 = scmp.eq.s32.totalorder %s1195_s16, 0 }
   0x8   : > { %p112_p3 = scmp.eq.s32.totalorder %s839_s17, 1  ;;  %p840_p5 = scmp.ge.s32.totalorder %s1124_s15, 1 }
   0x9   : > { %p1204_p4 = por %p1624_p1, %p40_p0  ;;  %p119_p7 = scmp.lt.s32.totalorder %s1124_s15, 3 }
   0xa   : > { %p1209_p6 = por %p112_p3, %p40_p0  ;;  %s1126_s21 = smov [#allocation5]  }
   0xb   : > { %s1627_s18 = scalar_select %p1204_p4, 1, 0 }
   0xc   : > { %s1628_s19 = scalar_select %p1209_p6, 1, 0 }
   0xd   : > { %p1214_p8 = pnand %p840_p5, %p119_p7  ;;  %s131_s22 = sshll.u32 %s1126_s21, 4  ;;  %s1218_s22 = int_to_ptr.vmem [resolvable:$true] %s131_s22 }
   0xe   : > { %s1127_s24 = smov [#allocation7]   ;;  %s968_s28 = scalar_lea.hbm %s1621_s1, 4608 }
   0xf   : > { %p871_p9 = pneg %p1214_p8  ;;  %s145_s25 = sshll.u32 %s1127_s24, 4  ;;  %s1229_s25 = int_to_ptr.vmem [resolvable:$true] %s145_s25 }
  0x10   : > { %p969_p12 = scmp.ne.s32.totalorder %s1621_s1, %s968_s28  ;;  %p975_p5 = scmp.lt.u32.totalorder %s968_s28, %s1621_s1 }
  0x11   : > { %p1225_p11 = pnand %p871_p9, %p1624_p1 }
  0x13   : > { %p970_p13 = pneg %p1225_p11 }
  0x15   : > { %p971_p0 = pnand %p970_p13, %p969_p12 }
  0x17   : > { %p972_p3 = pneg %p971_p0 }
  0x19   : > { %p977_p7 = pnand %p975_p5, %p972_p3 }
  0x1b   : > { %980 = shalt.err (!%p977_p7)
}
  0x1c   : > { %s981_s6 = scalar_lea.vmem %s1218_s22, 4608  ;;  %p989_p2 = scmp.lt.s32.totalorder %s1218_s22, %s1218_s22 }
  0x1d   : > { %p982_p9 = scmp.ne.s32.totalorder %s1218_s22, %s981_s6  ;;  %p990_p12 = scmp.lt.s32.totalorder %s981_s6, %s981_s6 }
  0x1f   : > { %p984_p10 = pnand %p982_p9, %p970_p13  ;;  %p991_p0 = por %p990_p12, %p989_p2 }
  0x21   : > { %p985_p1 = pneg %p984_p10 }
  0x23   : > { %p992_p6 = pnand %p991_p0, %p985_p1 }
  0x25   : > { %995 = shalt.err (!%p992_p6)
}
  0x26   : > { %s1128_s7 = smov 256   ;;  %s1129_s8 = smov 16  }
  0x27   : > { %874 = dma.hbm_to_vmem [thread:$0]  (!%p1225_p11), %s1621_s1, 4608, %s1218_s22, [#allocation6], %s1128_s7, %s1128_s7, %s1129_s8  }
  0x28   : > { %s996_s21 = scalar_lea.hbm %s1622_s2, 128 }
  0x29   : > { %p997_p2 = scmp.ne.s32.totalorder %s1622_s2, %s996_s21  ;;  %p1003_p10 = scmp.lt.u32.totalorder %s996_s21, %s1622_s2 }
  0x2b   : > { %p999_p1 = pnand %p997_p2, %p970_p13 }
  0x2d   : > { %p1000_p6 = pneg %p999_p1 }
  0x2f   : > { %p1005_p3 = pnand %p1003_p10, %p1000_p6 }
  0x31   : > { %1008 = shalt.err (!%p1005_p3)
}
  0x32   : > { %s1009_s22 = scalar_lea.vmem %s1229_s25, 128  ;;  %p1017_p12 = scmp.lt.s32.totalorder %s1229_s25, %s1229_s25 }
  0x33   : > { %p1010_p5 = scmp.ne.s32.totalorder %s1229_s25, %s1009_s22  ;;  %p1018_p0 = scmp.lt.s32.totalorder %s1009_s22, %s1009_s22 }
  0x35   : > { %p1012_p7 = pnand %p1010_p5, %p970_p13  ;;  %p1019_p2 = por %p1018_p0, %p1017_p12 }
  0x37   : > { %p1013_p9 = pneg %p1012_p7 }
  0x39   : > { %p1020_p1 = pnand %p1019_p2, %p1013_p9 }
  0x3b   : > { %1023 = shalt.err (!%p1020_p1)
}
  0x3c   : > { %877 = dma.hbm_to_vmem [thread:$0]  (!%p1225_p11), %s1622_s2, 128, %s1229_s25, [#allocation6]  }
  0x3d   : > { %s1284_s4 = sadd.s32 1, %s1124_s15   ;;  %s27_s23 = sadd.s32 1, %s1120_s14 }
  0x3e   : > { %s24_s5 = ssub.s32 %s1124_s15, %s1284_s4  ;;  %p34_p13 = scmp.ne.s32.totalorder %s1120_s14, %s1116_s13 }
  0x3f   : > { %p25_p6 = scmp.eq.s32.totalorder %s24_s5, 0  ;;  %p35_p10 = scmp.eq.s32.totalorder %s1124_s15, 0 }
  0x40   : > { %p1631_p3 = scmp.eq.s32.totalorder %s1195_s16, 1  ;;  %p888_p7 = scmp.lt.s32.totalorder %s1124_s15, 2 }
  0x41   : > { %s1300_s7 = scalar_select %p25_p6, %s1120_s14, %s27_s23  }
  0x42   : > { %p1294_p5 = por %p1631_p3, %p34_p13  ;;  %p36_p9 = por %p35_p10, %p34_p13 }
  0x43   : > { %s156_s8 = sand.u32 1, %s1120_s14   ;;  %s857_s25 = sshll.u32 %s1124_s15, 7 }
  0x44   : > { %s1632_s6 = scalar_select %p1294_p5, 1, 0 }
  0x45   : > { %s844_s9 = sshll.u32 %s156_s8, 3  ;;  %s1307_s17 = scalar_lea.hbm %s1620_s0, %s857_s25 }
  0x46   : > { %s160_s21 = scalar_lea.vmem [#allocation2], %s844_s9  ;;  %p1311_p11 = pnand %p888_p7, %p36_p9 }
  0x47   : > { %s168_s24 = sshll.u32 %s160_s21, 4  ;;  %s157_s27 = scalar_lea.sflag [#allocation3], %s156_s8  ;;  %s1309_s24 = int_to_ptr.vmem [resolvable:$true] %s168_s24 }
  0x48   : > { %s1024_s28 = scalar_lea.hbm %s1307_s17, 128  ;;  %p1026_p0 = pneg %p1311_p11 }
  0x49   : > { %p1025_p12 = scmp.ne.s32.totalorder %s1307_s17, %s1024_s28  ;;  %s1029_s30 = scalar_lea.hbm %s1620_s0, 256 }
  0x4a   : > { %p1030_p13 = scmp.lt.u32.totalorder %s1307_s17, %s1620_s0  ;;  %p1031_p6 = scmp.lt.u32.totalorder %s1029_s30, %s1024_s28 }
  0x4b   : > { %p1027_p2 = pnand %p1026_p0, %p1025_p12  ;;  %p1033_p3 = scmp.lt.u32.totalorder %s1024_s28, %s1307_s17 }
  0x4c   : > { %p1032_p10 = por %p1031_p6, %p1030_p13 }
  0x4d   : > { %p1028_p1 = pneg %p1027_p2 }
  0x4e   : > { %p1034_p7 = por %p1033_p3, %p1032_p10 }
  0x50   : > { %p1035_p9 = pnand %p1034_p7, %p1028_p1 }
  0x52   : > { %1038 = shalt.err (!%p1035_p9)
}
  0x53   : > { %s1039_s8 = scalar_lea.vmem %s1309_s24, 128  ;;  %s1130_s9 = smov [#allocation2]  }
  0x54   : > { %p1040_p12 = scmp.ne.s32.totalorder %s1309_s24, %s1039_s8  ;;  %s1044_s25 = sshll.u32 %s1130_s9, 4  ;;  %s1045_s25 = int_to_ptr.vmem [resolvable:$false] %s1044_s25 }
  0x55   : > { %s1046_s10 = scalar_lea.vmem %s1045_s25, 256  ;;  %p1047_p4 = scmp.lt.s32.totalorder %s1309_s24, %s1045_s25 }
  0x56   : > { %p1042_p2 = pnand %p1040_p12, %p1026_p0  ;;  %p1048_p13 = scmp.lt.s32.totalorder %s1046_s10, %s1039_s8 }
  0x58   : > { %p1043_p5 = pneg %p1042_p2  ;;  %p1049_p6 = por %p1048_p13, %p1047_p4 }
  0x5a   : > { %p1050_p10 = pnand %p1049_p6, %p1043_p5 }
  0x5c   : > { %1053 = shalt.err (!%p1050_p10)
}
  0x5d   : > { %881 = dma.hbm_to_vmem [thread:$0]  (!%p1311_p11), %s1307_s17, 128, %s1309_s24, %s157_s27  }
  0x5e   : > { %177 = sbr.rel (%p1214_p8) target bundleno = 918 (0x396), region = 32  ;;  %s1343_s11 = sand.u32 (!%p1214_p8), 1, %s1116_s13  }
  0x5f   : > { %s848_s21 = sshll.u32 (!%p1214_p8), %s1343_s11, 3  ;;  %s180_s28 = scalar_lea.sflag (!%p1214_p8), [#allocation3], %s1343_s11 }
  0x60   : > { %s183_s22 = scalar_lea.vmem (!%p1214_p8), [#allocation2], %s848_s21  ;;  %p1634_p4 = scmp.ne.s32.totalorder (!%p1214_p8), %s1627_s18, 0 }
  0x65   : > { %1099 = dma.done.wait (%p1634_p4), %s180_s28, 128  }
  0x66   : > { %1101 = vsyncadd (%p1634_p4), %s180_s28, 4294967168  ;;  %p1635_p5 = scmp.eq.s32.totalorder %s1195_s16, 0 }
  0x68   : > { %1103 = dma.done.wait (%p1635_p5), [#allocation6], 4736   ;;  %p1636_p11 = pmov %p1635_p5 }
  0x69   : > { %v1131_v0 = vmov 0   ;;  %v1132_v1 = vmov 2   ;;  %v1355_v2 = vld [vmem:[#allocation7] sm:$0xff]  ;;  %v1133_v3 = vmov 1   ;;  %v1134_v4 = vmov 3   ;;  %v215_v13 = vld [vmem:[%s183_s22] sm:$0xff] }
  0x6a   : > { %1105 = vsyncadd (%p1636_p11), [#allocation6], 4294962560  ;;  %950 = vset.pattern.permute.xlu0 %v1131_v0  ;;  %952 = vset.pattern.permute.xlu1 %v1132_v1  ;;  %v1135_v5 = vmov 4   ;;  %v1136_v6 = vmov 6   ;;  %v222_v7 = vlaneseq  ;;  %s1137_s18 = smov 17   ;;  %s1138_s20 = smov 16  }
  0x6b   : > { %218 = vperm.xlu0 %950, %v1355_v2   ;;  %271 = vperm.xlu1 %952, %v1355_v2   ;;  %s1139_s17 = smov 15   ;;  %s1140_s24 = smov 1   ;;  %v1145_v55 = vmov 7   ;;  %v1146_v56 = vmov 8   ;;  %v1147_v57 = vmov 9   ;;  %v1148_v58 = vmov 5  }
  0x6c   : > { %v223_v8 = vshrl.u32 %v222_v7, 7  ;;  %s1141_s26 = smov 127   ;;  %s1142_s27 = smov 113   ;;  %v1149_v59 = vmov 10   ;;  %v1436_v62 = vand.u32 127, %v222_v7  ;;  %v351_v1 = vld [vmem:[#allocation5 + $0x10] sm:$0xff] }
  0x6d   : > { %s1143_s29 = smov 112   ;;  %s1144_s30 = smov 111  }
  0x6e   : > { %v1363_v9 = vsub.s32 0, %v223_v8  ;;  %v1365_v10 = vsub.s32 4, %v223_v8  ;;  %v1367_v11 = vsub.s32 1, %v223_v8  ;;  %v1369_v12 = vsub.s32 5, %v223_v8  ;;  %s851_s23 = sshll.u32 %s1343_s11, 4  ;;  %s858_s5 = sshll.u32 %s1195_s16, 8 }
  0x6f   : > { %951 = vset.pattern.permute.xlu0 %v1133_v3  ;;  %953 = vset.pattern.permute.xlu1 %v1134_v4  ;;  %v1371_v14 = vsub.s32 2, %v223_v8  ;;  %v1373_v15 = vsub.s32 6, %v223_v8  ;;  %v1375_v16 = vsub.s32 3, %v223_v8  ;;  %v1377_v17 = vsub.s32 7, %v223_v8  ;;  %v352_v3 = vld [vmem:[#allocation5 + $0x18] sm:$0xff]  ;;  %s213_s8 = scalar_lea.vmem [#allocation8], %s851_s23  ;;  %s1576_s21 = scalar_lea.hbm %s1623_s3, %s858_s5 }
  0x70   : > { %245 = vperm.xlu0 %951, %v1355_v2   ;;  %297 = vperm.xlu1 %953, %v1355_v2   ;;  %v225_v18 = vrot.slane %v215_v13, %v1363_v9  ;;  %v229_v19 = vrot.slane %v215_v13, %v1365_v10  ;;  %v251_v20 = vrot.slane %v215_v13, %v1367_v11  ;;  %vm347_vm0 = vcmp.lt.s32.totalorder %v1436_v62, 16  ;;  %s750_s9 = sshll.u32 %s213_s8, 4  ;;  %s736_s28 = scalar_lea.sflag [#allocation4], %s1343_s11  ;;  %s1578_s9 = int_to_ptr.vmem [resolvable:$true] %s750_s9 }
  0x71   : > { %v255_v21 = vrot.slane %v215_v13, %v1369_v12  ;;  %v277_v22 = vrot.slane %v215_v13, %v1371_v14  ;;  %v281_v23 = vrot.slane %v215_v13, %v1373_v15  ;;  %v303_v26 = vrot.slane %v215_v13, %v1375_v16  ;;  %s1054_s16 = scalar_lea.vmem %s1578_s9, 256  ;;  %p1637_p0 = scmp.ne.s32.totalorder %s1632_s6, 0 }
  0x72   : > { %v307_v27 = vrot.slane %v215_v13, %v1377_v17  ;;  %v235_v28 = vrot.slane %v225_v18, %v1363_v9  ;;  %v239_v29 = vrot.slane %v229_v19, %v1363_v9  ;;  %v261_v30 = vrot.slane %v251_v20, %v1367_v11  ;;  %v338_v13 = vld [vmem:[#allocation5 + $0x8] sm:$0xff]  ;;  %v365_v20 = vld [vmem:[#allocation5 + $0x20] sm:$0xff]  ;;  %p1055_p8 = scmp.ne.s32.totalorder %s1578_s9, %s1054_s16  ;;  %s1153_s22 = smov [#allocation8]  }
  0x73   : > { %v265_v31 = vrot.slane %v255_v21, %v1367_v11  ;;  %v287_v32 = vrot.slane %v277_v22, %v1371_v14  ;;  %v291_v33 = vrot.slane %v281_v23, %v1371_v14  ;;  %v313_v34 = vrot.slane %v303_v26, %v1375_v16  ;;  %v366_v21 = vld [vmem:[#allocation5 + $0x28] sm:$0xff]  ;;  %v379_v26 = vld [vmem:[#allocation5 + $0x30] sm:$0xff] }
  0x74   : > { %954 = vset.pattern.permute.xlu1 %v1135_v5  ;;  %v317_v35 = vrot.slane %v307_v27, %v1375_v16  ;;  %955 = vset.pattern.permute.xlu0 %v1148_v58  ;;  %vm334_vm1 = vcmp.lt.s32.totalorder %v1436_v62, 17  ;;  %vm361_vm2 = vcmp.lt.s32.totalorder %v1436_v62, 15  ;;  %vm375_vm3 = vcmp.lt.s32.totalorder %v1436_v62, 1  ;;  %v380_v27 = vld [vmem:[#allocation5 + $0x38] sm:$0xff]  ;;  %v414_v58 = vld [vmem:[#allocation5 + $0x60] sm:$0xff]  ;;  %p1056_p1 = pnand %p1055_p8, %p1637_p0 }
  0x75   : > { %323 = vperm.xlu1 %954, %v1355_v2   ;;  %vm396_vm4 = vcmp.lt.s32.totalorder %v1436_v62, 127  ;;  %vm410_vm5 = vcmp.lt.s32.totalorder %v1436_v62, 113  ;;  %vm424_vm6 = vcmp.lt.s32.totalorder %v1436_v62, 112  ;;  %vm438_vm7 = vcmp.lt.s32.totalorder %v1436_v62, 111 }
  0x76   : > { %p1057_p3 = pneg %p1056_p1 }
  0x79   : > { %956 = vset.pattern.permute.xlu1 %v1136_v6  ;;  %v337_v6 = vld [vmem:[#allocation5] sm:$0xff] }
  0xea   : > { %v219_v24 = vpop.permute.xlu0 %218  ;;  %v272_v25 = vpop.permute.xlu1 %271 }
  0xeb   : > { %v240_v38 = vmul.f32 %v235_v28, %v219_v24  ;;  %v241_v39 = vmul.f32 %v239_v29, %v219_v24  ;;  %v292_v42 = vmul.f32 %v287_v32, %v272_v25  ;;  %v293_v43 = vmul.f32 %v291_v33, %v272_v25 }
  0xef   : > { %v246_v36 = vpop.permute.xlu0 %245  ;;  %v298_v37 = vpop.permute.xlu1 %297 }
  0xf0   : > { %v266_v40 = vmul.f32 %v261_v30, %v246_v36  ;;  %v267_v41 = vmul.f32 %v265_v31, %v246_v36  ;;  %v318_v46 = vmul.f32 %v313_v34, %v298_v37  ;;  %v319_v47 = vmul.f32 %v317_v35, %v298_v37 }
  0xf2   : > { %v268_v44 = vadd.f32 %v266_v40, %v240_v38  ;;  %v269_v45 = vadd.f32 %v267_v41, %v241_v39 }
  0xf4   : > { %v294_v48 = vadd.f32 %v292_v42, %v268_v44  ;;  %v295_v49 = vadd.f32 %v293_v43, %v269_v45  ;;  %v324_v50 = vpop.permute.xlu1 %323  ;;  %v386_v44 = vld [vmem:[#allocation5 + $0x40] sm:$0xff]  ;;  %v387_v45 = vld [vmem:[#allocation5 + $0x48] sm:$0xff] }
  0xf6   : > { %v320_v51 = vadd.f32 %v318_v46, %v294_v48  ;;  %v321_v52 = vadd.f32 %v319_v47, %v295_v49  ;;  %v400_v48 = vld [vmem:[#allocation5 + $0x50] sm:$0xff]  ;;  %v401_v49 = vld [vmem:[#allocation5 + $0x58] sm:$0xff] }
  0xf8   : > { %v1395_v53 = vadd.f32 %v324_v50, %v320_v51  ;;  %v1397_v54 = vadd.f32 %v324_v50, %v321_v52 }
  0xfa   : > { %330 = vrot.lane.b32.xlu1 %v1397_v54, %s1137_s18  ;;  %328 = vrot.lane.b32.xlu0 %v1395_v53, %s1137_s18  ;;  %v389_v52 = vmul.f32 %v387_v45, %v1397_v54 }
  0xfe   : > { %345 = vrot.lane.b32.xlu1 %v1397_v54, %s1138_s20  ;;  %343 = vrot.lane.b32.xlu0 %v1395_v53, %s1138_s20 }
 0x102   : > { %359 = vrot.lane.b32.xlu1 %v1397_v54, %s1139_s17  ;;  %357 = vrot.lane.b32.xlu0 %v1395_v53, %s1139_s17 }
 0x106   : > { %373 = vrot.lane.b32.xlu1 %v1397_v54, %s1140_s24  ;;  %371 = vrot.lane.b32.xlu0 %v1395_v53, %s1140_s24 }
 0x10a   : > { %394 = vrot.lane.b32.xlu1 %v1397_v54, %s1141_s26  ;;  %392 = vrot.lane.b32.xlu0 %v1395_v53, %s1141_s26 }
 0x10e   : > { %408 = vrot.lane.b32.xlu1 %v1397_v54, %s1142_s27  ;;  %406 = vrot.lane.b32.xlu0 %v1395_v53, %s1142_s27 }
 0x112   : > { %422 = vrot.lane.b32.xlu1 %v1397_v54, %s1143_s29  ;;  %420 = vrot.lane.b32.xlu0 %v1395_v53, %s1143_s29 }
 0x116   : > { %436 = vrot.lane.b32.xlu1 %v1397_v54, %s1144_s30  ;;  %434 = vrot.lane.b32.xlu0 %v1395_v53, %s1144_s30  ;;  %v429_v54 = vld [vmem:[#allocation5 + $0x78] sm:$0xff] }
 0x11a   : > { %485 = vperm.xlu1 %956, %v1355_v2  }
 0x11e   : > { %957 = vset.pattern.permute.xlu1 %v1145_v55  ;;  %v388_v55 = vmul.f32 %v386_v44, %v1395_v53 }
 0x11f   : > { %501 = vperm.xlu1 %957, %v1355_v2  }
 0x123   : > { %958 = vset.pattern.permute.xlu1 %v1146_v56 }
 0x124   : > { %517 = vperm.xlu1 %958, %v1355_v2  }
 0x128   : > { %959 = vset.pattern.permute.xlu1 %v1147_v57 }
 0x129   : > { %533 = vperm.xlu1 %959, %v1355_v2  }
 0x12d   : > { %960 = vset.pattern.permute.xlu1 %v1149_v59  ;;  %v415_v59 = vld [vmem:[#allocation5 + $0x68] sm:$0xff] }
 0x16c   : > { %v331_v60 = vpop.permute.xlu1 %330  ;;  %v329_v61 = vpop.permute.xlu0 %328 }
 0x16d   : > { %v335_v18 = vsel %vm334_vm1, %v329_v61, %v331_v60  ;;  %v336_v19 = vsel %vm334_vm1, %v331_v60, %v329_v61 }
 0x16e   : > { %v339_v28 = vmul.f32 %v337_v6, %v336_v19  ;;  %v340_v29 = vmul.f32 %v338_v13, %v335_v18 }
 0x170   : > { %v346_v63 = vpop.permute.xlu1 %345  ;;  %v344_v0 = vpop.permute.xlu0 %343 }
 0x171   : > { %v348_v4 = vsel %vm347_vm0, %v344_v0, %v346_v63  ;;  %v349_v5 = vsel %vm347_vm0, %v346_v63, %v344_v0 }
 0x172   : > { %v353_v24 = vmul.f32 %v351_v1, %v349_v5  ;;  %v354_v25 = vmul.f32 %v352_v3, %v348_v4  ;;  %v428_v4 = vld [vmem:[#allocation5 + $0x70] sm:$0xff] }
 0x174   : > { %v360_v8 = vpop.permute.xlu1 %359  ;;  %v358_v7 = vpop.permute.xlu0 %357  ;;  %v355_v36 = vadd.f32 %v353_v24, %v339_v28  ;;  %v356_v37 = vadd.f32 %v354_v25, %v340_v29 }
 0x175   : > { %v362_v22 = vsel %vm361_vm2, %v358_v7, %v360_v8  ;;  %v363_v23 = vsel %vm361_vm2, %v360_v8, %v358_v7 }
 0x176   : > { %v367_v30 = vmul.f32 %v365_v20, %v363_v23  ;;  %v368_v31 = vmul.f32 %v366_v21, %v362_v22  ;;  %v442_v22 = vld [vmem:[#allocation5 + $0x80] sm:$0xff]  ;;  %v443_v23 = vld [vmem:[#allocation5 + $0x88] sm:$0xff] }
 0x178   : > { %v374_v32 = vpop.permute.xlu1 %373  ;;  %v372_v33 = vpop.permute.xlu0 %371  ;;  %v369_v40 = vadd.f32 %v367_v30, %v355_v36  ;;  %v370_v41 = vadd.f32 %v368_v31, %v356_v37 }
 0x179   : > { %v376_v34 = vsel %vm375_vm3, %v372_v33, %v374_v32  ;;  %v377_v35 = vsel %vm375_vm3, %v374_v32, %v372_v33 }
 0x17a   : > { %v381_v38 = vmul.f32 %v379_v26, %v377_v35  ;;  %v382_v39 = vmul.f32 %v380_v27, %v376_v34 }
 0x17c   : > { %v395_v42 = vpop.permute.xlu1 %394  ;;  %v393_v43 = vpop.permute.xlu0 %392  ;;  %v383_v46 = vadd.f32 %v381_v38, %v369_v40  ;;  %v384_v47 = vadd.f32 %v382_v39, %v370_v41  ;;  %v1150_v40 = vmov 11   ;;  %v1151_v41 = vmov 13  }
 0x17d   : > { %v397_v50 = vsel %vm396_vm4, %v393_v43, %v395_v42  ;;  %v398_v51 = vsel %vm396_vm4, %v395_v42, %v393_v43  ;;  %v1152_v42 = vmov 12  }
 0x17e   : > { %v391_v63 = vadd.f32 %v389_v52, %v384_v47  ;;  %v390_v0 = vadd.f32 %v388_v55, %v383_v46  ;;  %v402_v1 = vmul.f32 %v400_v48, %v397_v50  ;;  %v403_v3 = vmul.f32 %v401_v49, %v398_v51 }
 0x180   : > { %v409_v56 = vpop.permute.xlu1 %408  ;;  %v407_v57 = vpop.permute.xlu0 %406  ;;  %v404_v18 = vadd.f32 %v402_v1, %v390_v0  ;;  %v405_v19 = vadd.f32 %v403_v3, %v391_v63 }
 0x181   : > { %v411_v60 = vsel %vm410_vm5, %v407_v57, %v409_v56  ;;  %v412_v61 = vsel %vm410_vm5, %v409_v56, %v407_v57 }
 0x182   : > { %v416_v5 = vmul.f32 %v414_v58, %v411_v60  ;;  %v417_v53 = vmul.f32 %v415_v59, %v412_v61 }
 0x184   : > { %v423_v6 = vpop.permute.xlu1 %422  ;;  %v421_v8 = vpop.permute.xlu0 %420  ;;  %v418_v24 = vadd.f32 %v416_v5, %v404_v18  ;;  %v419_v25 = vadd.f32 %v417_v53, %v405_v19 }
 0x185   : > { %v425_v7 = vsel %vm424_vm6, %v421_v8, %v423_v6  ;;  %v426_v13 = vsel %vm424_vm6, %v423_v6, %v421_v8 }
 0x186   : > { %v430_v20 = vmul.f32 %v428_v4, %v425_v7  ;;  %v431_v21 = vmul.f32 %v429_v54, %v426_v13 }
 0x188   : > { %v437_v26 = vpop.permute.xlu1 %436  ;;  %v435_v27 = vpop.permute.xlu0 %434  ;;  %v432_v30 = vadd.f32 %v430_v20, %v418_v24  ;;  %v433_v31 = vadd.f32 %v431_v21, %v419_v25 }
 0x189   : > { %v439_v28 = vsel %vm438_vm7, %v435_v27, %v437_v26  ;;  %v440_v29 = vsel %vm438_vm7, %v437_v26, %v435_v27 }
 0x18a   : > { %v444_v32 = vmul.f32 %v442_v22, %v439_v28  ;;  %v445_v33 = vmul.f32 %v443_v23, %v440_v29 }
 0x18c   : > { %v446_v34 = vadd.f32 %v444_v32, %v432_v30  ;;  %v447_v35 = vadd.f32 %v445_v33, %v433_v31 }
 0x18e   : > { %v448_v36 = vadd.f32 %v447_v35, %v446_v34  ;;  %v451_v37 = vmul.f32 %v446_v34, %v446_v34  ;;  %v452_v38 = vmul.f32 %v447_v35, %v447_v35 }
 0x190   : > { %449 = vadd.xlane.f32.xlu0 %v448_v36  ;;  %v453_v39 = vadd.f32 %v452_v38, %v451_v37 }
 0x192   : > { %454 = vadd.xlane.f32.xlu1 %v453_v39 }
 0x199   : > { %v486_v43 = vpop.permute.xlu1 %485 }
 0x19e   : > { %v502_v44 = vpop.permute.xlu1 %501 }
 0x1a3   : > { %549 = vperm.xlu1 %960, %v1355_v2   ;;  %v518_v45 = vpop.permute.xlu1 %517 }
 0x1a6   : > { %469 = vperm.xlu0 %955, %v1355_v2  }
 0x1a7   : > { %961 = vset.pattern.permute.xlu1 %v1150_v40 }
 0x1a8   : > { %565 = vperm.xlu1 %961, %v1355_v2   ;;  %v534_v46 = vpop.permute.xlu1 %533 }
 0x1aa   : > { %963 = vset.pattern.permute.xlu0 %v1151_v41 }
 0x1ab   : > { %597 = vperm.xlu0 %963, %v1355_v2  }
 0x1ac   : > { %962 = vset.pattern.permute.xlu1 %v1152_v42 }
 0x1ad   : > { %581 = vperm.xlu1 %962, %v1355_v2  }
 0x21d   : > { %v450_v47 = vpop.xlane.xlu0 %449 }
 0x21e   : > { %v456_v48 = vmul.f32 0.00390625, %v450_v47 }
 0x21f   : > { %v455_v49 = vpop.xlane.xlu1 %454 }
 0x220   : > { %v457_v50 = vmul.f32 0.00390625, %v455_v49  ;;  %v458_v51 = vmul.f32 %v456_v48, %v456_v48  ;;  %v460_v56 = vsub.f32 %v446_v34, %v456_v48  ;;  %v461_v57 = vsub.f32 %v447_v35, %v456_v48 }
 0x222   : > { %v459_v52 = vsub.f32 %v457_v50, %v458_v51 }
 0x223   : > { %v550_v1 = vpop.permute.xlu1 %549 }
 0x224   : > { %v462_v55 = vadd.f32 1e-05, %v459_v52 }
 0x225   : > { %v470_v3 = vpop.permute.xlu0 %469 }
 0x226   : > { %964 = vrsqrt.f32 %v462_v55 }
 0x227   : > { %v566_v25 = vpop.permute.xlu1 %565 }
 0x22a   : > { %v598_v47 = vpop.permute.xlu0 %597 }
 0x230   : > { %v965_v58 = vpop.eup %964 }
 0x231   : > { %v464_v59 = vmul.f32 %v965_v58, %v460_v56  ;;  %v465_v60 = vmul.f32 %v965_v58, %v461_v57 }
 0x233   : > { %v466_v61 = vmax.f32 %v464_v59, 0.0  ;;  %v467_v63 = vmax.f32 %v465_v60, 0.0  ;;  %v622_v59 = vld [vmem:[#allocation5 + $0xa0] sm:$0xff]  ;;  %v623_v60 = vld [vmem:[#allocation5 + $0xa8] sm:$0xff] }
 0x235   : > { %v475_v2 = vrot.slane %v466_v61, %v1363_v9  ;;  %v479_v0 = vrot.slane %v467_v63, %v1363_v9  ;;  %v491_v4 = vrot.slane %v466_v61, %v1367_v11  ;;  %v495_v54 = vrot.slane %v467_v63, %v1367_v11 }
 0x236   : > { %v507_v5 = vrot.slane %v466_v61, %v1371_v14  ;;  %v511_v53 = vrot.slane %v467_v63, %v1371_v14  ;;  %v523_v6 = vrot.slane %v466_v61, %v1375_v16  ;;  %v527_v8 = vrot.slane %v467_v63, %v1375_v16 }
 0x237   : > { %v496_v7 = vmul.f32 %v491_v4, %v486_v43  ;;  %v497_v13 = vmul.f32 %v495_v54, %v486_v43  ;;  %v480_v18 = vmul.f32 %v475_v2, %v470_v3  ;;  %v481_v19 = vmul.f32 %v479_v0, %v470_v3  ;;  %v609_v2 = vld [vmem:[#allocation5 + $0x90] sm:$0xff] }
 0x238   : > { %v512_v20 = vmul.f32 %v507_v5, %v502_v44  ;;  %v513_v9 = vmul.f32 %v511_v53, %v502_v44  ;;  %v539_v23 = vrot.slane %v466_v61, %v1365_v10  ;;  %v543_v11 = vrot.slane %v467_v63, %v1365_v10  ;;  %v635_v54 = vld [vmem:[#allocation5 + $0xb0] sm:$0xff]  ;;  %v636_v5 = vld [vmem:[#allocation5 + $0xb8] sm:$0xff] }
 0x239   : > { %v498_v21 = vadd.f32 %v496_v7, %v480_v18  ;;  %v499_v22 = vadd.f32 %v497_v13, %v481_v19  ;;  %v555_v24 = vrot.slane %v466_v61, %v1369_v12  ;;  %v559_v14 = vrot.slane %v467_v63, %v1369_v12  ;;  %v582_v12 = vpop.permute.xlu1 %581  ;;  %v648_v18 = vld [vmem:[#allocation5 + $0xc0] sm:$0xff]  ;;  %v649_v19 = vld [vmem:[#allocation5 + $0xc8] sm:$0xff] }
 0x23a   : > { %v528_v26 = vmul.f32 %v523_v6, %v518_v45  ;;  %v529_v27 = vmul.f32 %v527_v8, %v518_v45  ;;  %v571_v29 = vrot.slane %v466_v61, %v1373_v15  ;;  %v575_v30 = vrot.slane %v467_v63, %v1373_v15 }
 0x23b   : > { %v514_v16 = vadd.f32 %v512_v20, %v498_v21  ;;  %v515_v28 = vadd.f32 %v513_v9, %v499_v22  ;;  %v544_v33 = vmul.f32 %v539_v23, %v534_v46  ;;  %v545_v34 = vmul.f32 %v543_v11, %v534_v46 }
 0x23c   : > { %v587_v35 = vrot.slane %v466_v61, %v1377_v17  ;;  %v560_v10 = vmul.f32 %v555_v24, %v550_v1  ;;  %v561_v36 = vmul.f32 %v559_v14, %v550_v1  ;;  %v591_v39 = vrot.slane %v467_v63, %v1377_v17  ;;  %v610_v1 = vld [vmem:[#allocation5 + $0x98] sm:$0xff] }
 0x23d   : > { %v530_v31 = vadd.f32 %v528_v26, %v514_v16  ;;  %v531_v32 = vadd.f32 %v529_v27, %v515_v28  ;;  %v576_v40 = vmul.f32 %v571_v29, %v566_v25  ;;  %v577_v41 = vmul.f32 %v575_v30, %v566_v25 }
 0x23e   : > { %v592_v44 = vmul.f32 %v587_v35, %v582_v12  ;;  %v593_v48 = vmul.f32 %v591_v39, %v582_v12  ;;  %v668_v35 = vld [vmem:[#allocation5 + $0xe0] sm:$0xff] }
 0x23f   : > { %v546_v37 = vadd.f32 %v544_v33, %v530_v31  ;;  %v547_v38 = vadd.f32 %v545_v34, %v531_v32  ;;  %v655_v31 = vld [vmem:[#allocation5 + $0xd0] sm:$0xff]  ;;  %v656_v32 = vld [vmem:[#allocation5 + $0xd8] sm:$0xff] }
 0x241   : > { %v562_v42 = vadd.f32 %v560_v10, %v546_v37  ;;  %v563_v43 = vadd.f32 %v561_v36, %v547_v38  ;;  %v669_v10 = vld [vmem:[#allocation5 + $0xe8] sm:$0xff] }
 0x243   : > { %v578_v45 = vadd.f32 %v576_v40, %v562_v42  ;;  %v579_v15 = vadd.f32 %v577_v41, %v563_v43  ;;  %v681_v40 = vld [vmem:[#allocation5 + $0xf0] sm:$0xff]  ;;  %v682_v41 = vld [vmem:[#allocation5 + $0xf8] sm:$0xff] }
 0x245   : > { %v594_v49 = vadd.f32 %v592_v44, %v578_v45  ;;  %v595_v46 = vadd.f32 %v593_v48, %v579_v15 }
 0x247   : > { %v1501_v50 = vadd.f32 %v598_v47, %v594_v49  ;;  %v1507_v17 = vadd.f32 %v598_v47, %v595_v46  ;;  %v694_v49 = vld [vmem:[#allocation5 + $0x100] sm:$0xff]  ;;  %v695_v46 = vld [vmem:[#allocation5 + $0x108] sm:$0xff] }
 0x249   : > { %615 = vrot.lane.b32.xlu0 %v1501_v50, %s1138_s20  ;;  %602 = vrot.lane.b32.xlu1 %v1501_v50, %s1137_s18  ;;  %v658_v38 = vmul.f32 %v656_v32, %v1507_v17  ;;  %v657_v12 = vmul.f32 %v655_v31, %v1501_v50 }
 0x24d   : > { %628 = vrot.lane.b32.xlu0 %v1501_v50, %s1139_s17  ;;  %604 = vrot.lane.b32.xlu1 %v1507_v17, %s1137_s18  ;;  %s1058_s18 = sshll.u32 %s1153_s22, 4  ;;  %s1059_s18 = int_to_ptr.vmem [resolvable:$false] %s1058_s18 }
 0x24e   : > { %p1061_p7 = scmp.lt.s32.totalorder %s1578_s9, %s1059_s18 }
 0x251   : > { %641 = vrot.lane.b32.xlu0 %v1501_v50, %s1140_s24  ;;  %617 = vrot.lane.b32.xlu1 %v1507_v17, %s1138_s20  ;;  %s1060_s20 = scalar_lea.vmem %s1059_s18, 512 }
 0x252   : > { %p1062_p9 = scmp.lt.s32.totalorder %s1060_s20, %s1054_s16 }
 0x254   : > { %p1063_p12 = por %p1062_p9, %p1061_p7 }
 0x255   : > { %661 = vrot.lane.b32.xlu0 %v1501_v50, %s1141_s26  ;;  %630 = vrot.lane.b32.xlu1 %v1507_v17, %s1139_s17 }
 0x256   : > { %p1064_p2 = pnand %p1063_p12, %p1057_p3 }
 0x259   : > { %674 = vrot.lane.b32.xlu0 %v1501_v50, %s1142_s27  ;;  %643 = vrot.lane.b32.xlu1 %v1507_v17, %s1140_s24 }
 0x25d   : > { %687 = vrot.lane.b32.xlu0 %v1501_v50, %s1143_s29  ;;  %663 = vrot.lane.b32.xlu1 %v1507_v17, %s1141_s26 }
 0x261   : > { %700 = vrot.lane.b32.xlu0 %v1501_v50, %s1144_s30  ;;  %676 = vrot.lane.b32.xlu1 %v1507_v17, %s1142_s27 }
 0x265   : > { %689 = vrot.lane.b32.xlu1 %v1507_v17, %s1143_s29 }
 0x269   : > { %702 = vrot.lane.b32.xlu1 %v1507_v17, %s1144_s30 }
 0x2bb   : > { %v616_v51 = vpop.permute.xlu0 %615  ;;  %v603_v52 = vpop.permute.xlu1 %602 }
 0x2bf   : > { %v629_v55 = vpop.permute.xlu0 %628  ;;  %v605_v56 = vpop.permute.xlu1 %604 }
 0x2c0   : > { %v606_v3 = vsel %vm334_vm1, %v603_v52, %v605_v56  ;;  %v607_v4 = vsel %vm334_vm1, %v605_v56, %v603_v52 }
 0x2c1   : > { %v611_v20 = vmul.f32 %v609_v2, %v607_v4  ;;  %v612_v9 = vmul.f32 %v610_v1, %v606_v3 }
 0x2c3   : > { %v642_v57 = vpop.permute.xlu0 %641  ;;  %v618_v58 = vpop.permute.xlu1 %617 }
 0x2c4   : > { %v619_v61 = vsel %vm347_vm0, %v616_v51, %v618_v58  ;;  %v620_v63 = vsel %vm347_vm0, %v618_v58, %v616_v51 }
 0x2c5   : > { %v624_v8 = vmul.f32 %v622_v59, %v620_v63  ;;  %v625_v7 = vmul.f32 %v623_v60, %v619_v61  ;;  %v707_v60 = vld [vmem:[#allocation5 + $0x110] sm:$0xff]  ;;  %v708_v61 = vld [vmem:[#allocation5 + $0x118] sm:$0xff] }
 0x2c7   : > { %v631_v0 = vpop.permute.xlu1 %630  ;;  %v662_v13 = vpop.permute.xlu0 %661  ;;  %v626_v14 = vadd.f32 %v624_v8, %v611_v20  ;;  %v627_v25 = vadd.f32 %v625_v7, %v612_v9 }
 0x2c8   : > { %v632_v53 = vsel %vm361_vm2, %v629_v55, %v631_v0  ;;  %v633_v6 = vsel %vm361_vm2, %v631_v0, %v629_v55 }
 0x2c9   : > { %v637_v21 = vmul.f32 %v635_v54, %v633_v6  ;;  %v638_v22 = vmul.f32 %v636_v5, %v632_v53 }
 0x2cb   : > { %v644_v23 = vpop.permute.xlu1 %643  ;;  %v639_v16 = vadd.f32 %v637_v21, %v626_v14  ;;  %v640_v28 = vadd.f32 %v638_v22, %v627_v25  ;;  %v675_v29 = vpop.permute.xlu0 %674 }
 0x2cc   : > { %v645_v11 = vsel %vm375_vm3, %v642_v57, %v644_v23  ;;  %v646_v24 = vsel %vm375_vm3, %v644_v23, %v642_v57 }
 0x2cd   : > { %v650_v26 = vmul.f32 %v648_v18, %v646_v24  ;;  %v651_v27 = vmul.f32 %v649_v19, %v645_v11 }
 0x2cf   : > { %v664_v30 = vpop.permute.xlu1 %663  ;;  %v652_v33 = vadd.f32 %v650_v26, %v639_v16  ;;  %v653_v34 = vadd.f32 %v651_v27, %v640_v28  ;;  %v688_v44 = vpop.permute.xlu0 %687 }
 0x2d0   : > { %v665_v36 = vsel %vm396_vm4, %v662_v13, %v664_v30  ;;  %v666_v37 = vsel %vm396_vm4, %v664_v30, %v662_v13 }
 0x2d1   : > { %v660_v45 = vadd.f32 %v658_v38, %v653_v34  ;;  %v659_v15 = vadd.f32 %v657_v12, %v652_v33  ;;  %v670_v47 = vmul.f32 %v668_v35, %v665_v36  ;;  %v671_v48 = vmul.f32 %v669_v10, %v666_v37 }
 0x2d3   : > { %v677_v39 = vpop.permute.xlu1 %676  ;;  %v672_v56 = vadd.f32 %v670_v47, %v659_v15  ;;  %v673_v57 = vadd.f32 %v671_v48, %v660_v45  ;;  %v701_v63 = vpop.permute.xlu0 %700 }
 0x2d4   : > { %v678_v42 = vsel %vm410_vm5, %v675_v29, %v677_v39  ;;  %v679_v43 = vsel %vm410_vm5, %v677_v39, %v675_v29 }
 0x2d5   : > { %v683_v51 = vmul.f32 %v681_v40, %v678_v42  ;;  %v684_v17 = vmul.f32 %v682_v41, %v679_v43 }
 0x2d7   : > { %v690_v52 = vpop.permute.xlu1 %689  ;;  %v685_v2 = vadd.f32 %v683_v51, %v672_v56  ;;  %v686_v0 = vadd.f32 %v684_v17, %v673_v57 }
 0x2d8   : > { %v691_v50 = vsel %vm424_vm6, %v688_v44, %v690_v52  ;;  %v692_v55 = vsel %vm424_vm6, %v690_v52, %v688_v44 }
 0x2d9   : > { %v696_v58 = vmul.f32 %v694_v49, %v691_v50  ;;  %v697_v59 = vmul.f32 %v695_v46, %v692_v55 }
 0x2db   : > { %v703_v1 = vpop.permute.xlu1 %702  ;;  %v698_v54 = vadd.f32 %v696_v58, %v685_v2  ;;  %v699_v5 = vadd.f32 %v697_v59, %v686_v0 }
 0x2dc   : > { %v704_v3 = vsel %vm438_vm7, %v701_v63, %v703_v1  ;;  %v705_v4 = vsel %vm438_vm7, %v703_v1, %v701_v63 }
 0x2dd   : > { %v709_v53 = vmul.f32 %v707_v60, %v704_v3  ;;  %v710_v6 = vmul.f32 %v708_v61, %v705_v4 }
 0x2df   : > { %v711_v8 = vadd.f32 %v709_v53, %v698_v54  ;;  %v712_v7 = vadd.f32 %v710_v6, %v699_v5 }
 0x2e1   : > { %v713_v13 = vadd.f32 %v712_v7, %v711_v8  ;;  %v716_v18 = vmul.f32 %v711_v8, %v711_v8  ;;  %v717_v19 = vmul.f32 %v712_v7, %v712_v7 }
 0x2e3   : > { %714 = vadd.xlane.f32.xlu0 %v713_v13  ;;  %v718_v20 = vadd.f32 %v717_v19, %v716_v18 }
 0x2e5   : > { %719 = vadd.xlane.f32.xlu1 %v718_v20 }
 0x370   : > { %v715_v9 = vpop.xlane.xlu0 %714 }
 0x371   : > { %v721_v21 = vmul.f32 0.00390625, %v715_v9 }
 0x372   : > { %v720_v22 = vpop.xlane.xlu1 %719 }
 0x373   : > { %v722_v23 = vmul.f32 0.00390625, %v720_v22  ;;  %v723_v62 = vmul.f32 %v721_v21, %v721_v21  ;;  %v725_v14 = vsub.f32 %v711_v8, %v721_v21  ;;  %v726_v25 = vsub.f32 %v712_v7, %v721_v21 }
 0x375   : > { %v724_v11 = vsub.f32 %v722_v23, %v723_v62 }
 0x377   : > { %v727_v24 = vadd.f32 1e-05, %v724_v11 }
 0x379   : > { %966 = vrsqrt.f32 %v727_v24 }
 0x383   : > { %v967_v26 = vpop.eup %966 }
 0x384   : > { %v729_v27 = vmul.f32 %v967_v26, %v725_v14  ;;  %v730_v16 = vmul.f32 %v967_v26, %v726_v25 }
 0x386   : > { %v731_v28 = vmax.f32 %v729_v27, 0.0  ;;  %v732_v29 = vmax.f32 %v730_v16, 0.0 }
 0x388   : > { %733 = vst [vmem:[%s213_s8] sm:$0xff] %v731_v28  ;;  %734 = vst [vmem:[%s213_s8 + $0x8] sm:$0xff] %v732_v29 }
 0x389   : > { %1067 = shalt.err (!%p1064_p2)
}
 0x38a   : > { %s1068_s11 = scalar_lea.hbm %s1576_s21, 256  ;;  %s1072_s26 = scalar_lea.hbm %s1623_s3, 512 }
 0x38b   : > { %p1069_p13 = scmp.ne.s32.totalorder %s1576_s21, %s1068_s11  ;;  %p1073_p4 = scmp.lt.u32.totalorder %s1576_s21, %s1623_s3 }
 0x38c   : > { %p1074_p5 = scmp.lt.u32.totalorder %s1072_s26, %s1068_s11  ;;  %p1076_p8 = scmp.lt.u32.totalorder %s1068_s11, %s1576_s21 }
 0x38d   : > { %p1070_p6 = pnand %p1069_p13, %p1637_p0 }
 0x38e   : > { %p1075_p11 = por %p1074_p5, %p1073_p4 }
 0x38f   : > { %p1071_p10 = pneg %p1070_p6 }
 0x390   : > { %p1077_p1 = por %p1076_p8, %p1075_p11 }
 0x392   : > { %p1078_p3 = pnand %p1077_p1, %p1071_p10 }
 0x394   : > { %1081 = shalt.err (!%p1078_p3)
}
 0x395   : > { %869 = dma.vmem_to_hbm [thread:$0]  (%p1637_p0), %s1578_s9, 256, %s1576_s21, %s736_s28  }
 0x396 PF: > { %s762_s30 = sand.u32 1, %s1112_s12   ;;  %p1638_p7 = scmp.ne.s32.totalorder %s1628_s19, 0 }
 0x397   : > { %p1639_p9 = scmp.ge.s32.totalorder %s1124_s15, 2  ;;  %s763_s23 = scalar_lea.sflag [#allocation4], %s762_s30 }
 0x399   : > { %p883_p12 = pnand %p1639_p9, %p1638_p7 }
 0x39b   : > { %1107 = dma.done.wait (!%p883_p12), %s763_s23, 256  }
 0x39c   : > { %1109 = vsyncadd (!%p883_p12), %s763_s23, 4294967040  ;;  %p17_p2 = scmp.ge.s32.totalorder %s1284_s4, 4   ;;  %s1640_s12 = smov %s1116_s13 }
 0x39d   : > { %s1641_s13 = smov %s1120_s14  ;;  %s1642_s14 = smov %s1300_s7 }
 0x39e   : > { %s1643_s15 = smov %s1284_s4  ;;  %19 = sbr.rel (!%p17_p2) target bundleno = 6 (0x6), region = 102 }
 0x3a5   :  { %768 = vsyncpa [#allocation3], 1 }
 0x3a6   :  { %770 = vsyncpa [#allocation3 + $0x1], 1 }
 0x3a7   :  { %771 = vsyncpa [#allocation6], 1 }
 0x3a8   :  { %772 = vsyncpa [#allocation4], 1 }
 0x3a9   :  { %774 = vsyncpa [#allocation4 + $0x1], 1 }

</bundles_post_ra>
